<compile_context>
chip_gen: v6e
topology: v6e:2x2x1
jax: 0.10.0
libtpu: 0.0.40
codegen_flags: <defaults>
</compile_context>

<pallas_src>
import functools

import jax
import jax.numpy as jnp
from jax.experimental import pallas as pl
from jax.experimental.pallas import tpu as pltpu

_LANE = 128


def _round_up(x, m):
    return ((x + m - 1) // m) * m


def _vmem_params():
    """(chooser budget, vmem_limit_bytes, want_multi_d_tiles) per generation."""
    vmem_cap = 128 * 1024 * 1024
    try:
        vmem_cap = int(pltpu.get_tpu_info().vmem_capacity_bytes)
    except Exception:  # query not available -> assume 128 MiB class part
        pass
    if vmem_cap <= 64 * 1024 * 1024:
        # v7x-class: 64 MiB / TC, 2 TCs.  Modest budget, conservative limit,
        # and insist on >=2 D tiles so dimension_semantics=("parallel",) can
        # actually shard across the two TensorCores.
        return 20 * 1024 * 1024, 40 * 1024 * 1024, True
    # v5e/v6e-class: 128 MiB, single TC.  Bigger blocks amortize the ~0.35us
    # per-grid-step overhead and keep DMAs in long unmasked bursts.
    return 40 * 1024 * 1024, 96 * 1024 * 1024, False


def _largest_divisor_tile(d_pad, max_cols, want_multi_tile):
    """Largest lane-multiple tile width that divides d_pad and fits max_cols.

    If want_multi_tile (v7x, 2 TCs), avoid a single tile covering all of D
    whenever d_pad > 128 so the parallel D axis has >=2 grid steps.
    """
    lanes = d_pad // _LANE
    best = _LANE
    for k in range(1, lanes + 1):
        if lanes % k:
            continue
        t = k * _LANE
        if t > max_cols:
            break
        if want_multi_tile and lanes > 1 and (lanes // k) < 2:
            continue
        best = t
    return best


# ----------------------------------------------------------------------------
# single-pass kernel: full N rows per D tile
# ----------------------------------------------------------------------------
def _bn_train_kernel(x_ref, lg_ref, beta_ref,
                     y_ref, mean_ref, var_ref, ld_ref, *, eps, inv_n):
    # x_ref: (N, tD); lg/beta: (1, tD); y: (N, tD); mean/var/ld: (1, tD)
    xs = x_ref[...].astype(jnp.float32)

    # Batch statistics (biased variance, matching torch .var(0, unbiased=False));
    # two-pass (mean, then centered variance) for numerical robustness.
    mean = jnp.sum(xs, axis=0, keepdims=True) * inv_n          # (1, tD)
    diff = xs - mean                                           # (N, tD) reused below
    var = jnp.sum(diff * diff, axis=0, keepdims=True) * inv_n

    inv_std = jax.lax.rsqrt(var + eps)
    lg = lg_ref[...].astype(jnp.float32)
    scale = jnp.exp(lg) * inv_std

    # Fused affine reusing `diff`: y = (x - mean) * scale + beta
    # (drops the extra xs read and the shift = beta - mean*scale row op).
    y_ref[...] = (diff * scale + beta_ref[...].astype(jnp.float32)).astype(y_ref.dtype)

    mean_ref[...] = mean
    var_ref[...] = var
    # Per-column log|det J| term; summed over the valid D columns in the wrapper.
    ld_ref[...] = lg - 0.5 * jnp.log(var + eps)


# ----------------------------------------------------------------------------
# two-pass (N-tiled) fallback: stats kernel + normalize kernel
# ----------------------------------------------------------------------------
def _bn_stats_kernel(x_ref, mean_ref, var_ref, acc_s, acc_q, *, inv_n):
    # grid = (D_tiles, N_tiles); N axis last, "arbitrary" (reduction).
    jn = pl.program_id(1)

    @pl.when(jn == 0)
    def _():
        acc_s[...] = jnp.zeros_like(acc_s)
        acc_q[...] = jnp.zeros_like(acc_q)

    xs = x_ref[...].astype(jnp.float32)
    acc_s[...] += jnp.sum(xs, axis=0, keepdims=True)
    acc_q[...] += jnp.sum(xs * xs, axis=0, keepdims=True)

    @pl.when(jn == pl.num_programs(1) - 1)
    def _():
        mean = acc_s[...] * inv_n
        # TODO(synk): E[x^2]-mean^2 cancels catastrophically if |mean| >> std;
        # switch to a centered second stats pass / block-merge Welford if that
        # regime matters.
        var = jnp.maximum(acc_q[...] * inv_n - mean * mean, 0.0)
        mean_ref[...] = mean
        var_ref[...] = var


def _bn_norm_kernel(x_ref, mean_ref, scale_ref, beta_ref, y_ref):
    xs = x_ref[...].astype(jnp.float32)
    y_ref[...] = ((xs - mean_ref[...]) * scale_ref[...] + beta_ref[...]).astype(y_ref.dtype)


def _two_pass_forward(x2d, lg2, b2, d_pad, n, eps,
                      budget_bytes, vmem_limit, want_multi, x_dtype,
                      tile_n_override=None):
    itemsize = jnp.dtype(x_dtype).itemsize
    tile_n = tile_n_override if tile_n_override else min(_round_up(n, 8), 1024)
    tile_n = max(8, (tile_n // 8) * 8)

    # per-column working set for a (tile_n, tile_d) block (dbl-buffered x + y
    # + f32 temps), conservative.
    per_col = tile_n * (4 * itemsize + 12) + 64
    max_cols = max(_LANE, (budget_bytes // max(per_col, 1)) // _LANE * _LANE)
    max_cols = min(max_cols, 2048)
    tile_d = _largest_divisor_tile(d_pad, max_cols, want_multi)

    n_pad = _round_up(n, tile_n)
    if n_pad != n:
        # Zero rows contribute 0 to sum / sum-of-squares; stats divide by the
        # true n, padded y rows are sliced off below.
        x2d = jnp.pad(x2d, ((0, n_pad - n), (0, 0)))

    num_d = d_pad // tile_d
    num_n = n_pad // tile_n

    # ---- pass 1: per-feature sum / sumsq -> mean / biased var ---------------
    stats_kernel = functools.partial(_bn_stats_kernel, inv_n=1.0 / n)
    row_spec_dn = pl.BlockSpec((1, tile_d), lambda jd, jn: (0, jd))
    mean, var = pl.pallas_call(
        stats_kernel,
        out_shape=(jax.ShapeDtypeStruct((1, d_pad), jnp.float32),
                   jax.ShapeDtypeStruct((1, d_pad), jnp.float32)),
        grid=(num_d, num_n),
        in_specs=[pl.BlockSpec((tile_n, tile_d), lambda jd, jn: (jn, jd))],
        out_specs=(row_spec_dn, row_spec_dn),
        scratch_shapes=[pltpu.VMEM((1, tile_d), jnp.float32),
                        pltpu.VMEM((1, tile_d), jnp.float32)],
        compiler_params=pltpu.CompilerParams(
            dimension_semantics=("parallel", "arbitrary"),
            vmem_limit_bytes=vmem_limit),
    )(x2d)

    # tiny (1, d_pad) glue rows for the normalize pass
    lg32 = lg2.astype(jnp.float32)
    scale = jnp.exp(lg32) * jax.lax.rsqrt(var + eps)
    beta32 = b2.astype(jnp.float32)

    # ---- pass 2: elementwise normalize --------------------------------------
    row_spec_nd = pl.BlockSpec((1, tile_d), lambda i, j: (0, j))
    y2d = pl.pallas_call(
        _bn_norm_kernel,
        out_shape=jax.ShapeDtypeStruct((n_pad, d_pad), x_dtype),
        grid=(num_n, num_d),
        in_specs=[pl.BlockSpec((tile_n, tile_d), lambda i, j: (i, j)),
                  row_spec_nd, row_spec_nd, row_spec_nd],
        out_specs=pl.BlockSpec((tile_n, tile_d), lambda i, j: (i, j)),
        compiler_params=pltpu.CompilerParams(
            dimension_semantics=("parallel", "parallel"),
            vmem_limit_bytes=vmem_limit),
    )(x2d, mean, scale, beta32)

    ld_row = lg32 - 0.5 * jnp.log(var + eps)   # (1, d_pad) glue
    return y2d[:n], mean, var, ld_row


# ----------------------------------------------------------------------------
# wrapper
# ----------------------------------------------------------------------------
def batchnorm_forward(x, log_gamma, beta, running_mean, running_var,
                      momentum=0.9, eps=1e-5, training=True,
                      force_two_pass=False, _tile_n_override=None):
    """Returns (y, log_abs_det_jacobian, new_running_mean, new_running_var).

    Matches the RealNVP-style BatchNorm.forward() (training mode is the hot path).
    """
    orig_shape = x.shape
    d = orig_shape[-1]
    batch = orig_shape[0]
    x2d = x.reshape(-1, d)                                    # (N, D), glue
    n = x2d.shape[0]

    if not training:
        # TODO(synk): eval-mode (running-stats) path is plain JAX glue, not a kernel.
        inv_std = jax.lax.rsqrt(running_var.astype(jnp.float32) + eps)
        scale = jnp.exp(log_gamma) * inv_std
        shift = beta - running_mean * scale
        y = (x2d.astype(jnp.float32) * scale + shift).astype(x.dtype)
        logdet = jnp.sum(log_gamma - 0.5 * jnp.log(running_var + eps))
        return (y.reshape(orig_shape), jnp.broadcast_to(logdet, (batch,)),
                running_mean, running_var)

    budget_bytes, vmem_limit, want_multi = _vmem_params()
    itemsize = jnp.dtype(x.dtype).itemsize

    # --- pad the feature axis ONLY to the 128-lane requirement ---------------
    d_pad = _round_up(d, _LANE)
    if d_pad != d:
        x2d = jnp.pad(x2d, ((0, 0), (0, d_pad - d)))
        lg2 = jnp.pad(log_gamma.reshape(1, d), ((0, 0), (0, d_pad - d)))
        b2 = jnp.pad(beta.reshape(1, d), ((0, 0), (0, d_pad - d)))
    else:
        lg2 = log_gamma.reshape(1, d)
        b2 = beta.reshape(1, d)

    # per-column working set of a full-N (N, tile_d) block: double-buffered
    # x + y blocks plus f32 temporaries.
    per_col = n * (4 * itemsize + 16) + 64
    single_pass_fits = per_col * _LANE <= budget_bytes

    if single_pass_fits and not force_two_pass:
        max_cols = max(_LANE, (budget_bytes // max(per_col, 1)) // _LANE * _LANE)
        max_cols = min(max_cols, 2048)
        tile_d = _largest_divisor_tile(d_pad, max_cols, want_multi)
        grid = (d_pad // tile_d,)

        kernel = functools.partial(_bn_train_kernel, eps=float(eps), inv_n=1.0 / n)
        row_spec = pl.BlockSpec((1, tile_d), lambda j: (0, j))
        cost = pl.CostEstimate(
            flops=int(8 * n * d_pad),
            transcendentals=int(3 * d_pad),
            bytes_accessed=int(2 * n * d_pad * itemsize + 6 * d_pad * 4))

        y2d, mean, var, ld = pl.pallas_call(
            kernel,
            out_shape=(
                jax.ShapeDtypeStruct((n, d_pad), x.dtype),       # y
                jax.ShapeDtypeStruct((1, d_pad), jnp.float32),   # batch_mean
                jax.ShapeDtypeStruct((1, d_pad), jnp.float32),   # batch_var
                jax.ShapeDtypeStruct((1, d_pad), jnp.float32),   # per-col logdet term
            ),
            grid=grid,
            in_specs=[
                pl.BlockSpec((n, tile_d), lambda j: (0, j)),     # x block (full N)
                row_spec,                                        # log_gamma
                row_spec,                                        # beta
            ],
            out_specs=(
                pl.BlockSpec((n, tile_d), lambda j: (0, j)),     # y block (lane-dense)
                row_spec, row_spec, row_spec,
            ),
            compiler_params=pltpu.CompilerParams(
                dimension_semantics=("parallel",),               # megacore over D tiles
                vmem_limit_bytes=vmem_limit),
            cost_estimate=cost,
        )(x2d, lg2, b2)
        ld_row = ld
    else:
        # N-tiled two-pass fallback (large N or forced for testing).
        y2d, mean, var, ld_row = _two_pass_forward(
            x2d, lg2, b2, d_pad, n, float(eps),
            budget_bytes, vmem_limit, want_multi, x.dtype,
            tile_n_override=_tile_n_override)

    batch_mean = mean[0, :d]
    batch_var = var[0, :d]
    logdet_scalar = jnp.sum(ld_row[0, :d])

    # Flow-style EMA (decay form) with the biased batch variance -- matches the
    # reference module exactly (this is NOT torch.nn.BatchNorm's convention).
    new_running_mean = running_mean * momentum + batch_mean * (1.0 - momentum)
    new_running_var = running_var * momentum + batch_var * (1.0 - momentum)

    y = y2d[:, :d].reshape(orig_shape)   # no-op slice when d % 128 == 0
    log_abs_det_jacobian = jnp.broadcast_to(logdet_scalar, (batch,))
    return y, log_abs_det_jacobian, new_running_mean, new_running_var


def _reference_forward(x, log_gamma, beta, eps):
    d = x.shape[-1]
    x2d = x.reshape(-1, d).astype(jnp.float32)
    mean = jnp.mean(x2d, axis=0)
    var = jnp.mean((x2d - mean) ** 2, axis=0)
    x_hat = (x2d - mean) / jnp.sqrt(var + eps)
    y = jnp.exp(log_gamma) * x_hat + beta
    logdet = jnp.sum(log_gamma - 0.5 * jnp.log(var + eps))
    return y.reshape(x.shape), jnp.broadcast_to(logdet, (x.shape[0],)), mean, var


if __name__ == "__main__":
    key = jax.random.PRNGKey(0)
    k_x, k_g, k_b = jax.random.split(key, 3)

    B, T, D = 2, 8, 32          # x.view(-1, D) -> N = 16 rows
    x = jax.random.normal(k_x, (B, T, D), dtype=jnp.float32)

    # __init__ uses zeros for log_gamma/beta; use small deterministic values
    # so the affine path is actually exercised.
    log_gamma = 0.1 * jax.random.normal(k_g, (D,), dtype=jnp.float32)
    beta = 0.1 * jax.random.normal(k_b, (D,), dtype=jnp.float32)
    running_mean = jnp.zeros((D,), dtype=jnp.float32)
    running_var = jnp.ones((D,), dtype=jnp.float32)

    # --- single-pass (hot) path ----------------------------------------------
    y, logdet, rm, rv = batchnorm_forward(
        x, log_gamma, beta, running_mean, running_var,
        momentum=0.9, eps=1e-5, training=True)
    jax.block_until_ready((y, logdet, rm, rv))

    y_ref, logdet_ref, mean_ref, var_ref = _reference_forward(x, log_gamma, beta, 1e-5)
    rm_ref = running_mean * 0.9 + mean_ref * 0.1
    rv_ref = running_var * 0.9 + var_ref * 0.1

    assert jnp.allclose(y, y_ref, atol=1e-5, rtol=1e-5)
    assert jnp.allclose(logdet, logdet_ref, atol=1e-5, rtol=1e-5)
    assert jnp.allclose(rm, rm_ref, atol=1e-5, rtol=1e-5)
    assert jnp.allclose(rv, rv_ref, atol=1e-5, rtol=1e-5)

    # --- N-tiled two-pass fallback (forced, with multiple N grid steps) -------
    B2, T2 = 4, 16              # N = 64 rows, tile_n = 16 -> 4 reduction steps
    x2 = jax.random.normal(k_x, (B2, T2, D), dtype=jnp.float32)
    y2, logdet2, rm2, rv2 = batchnorm_forward(
        x2, log_gamma, beta, running_mean, running_var,
        momentum=0.9, eps=1e-5, training=True,
        force_two_pass=True, _tile_n_override=16)
    jax.block_until_ready((y2, logdet2, rm2, rv2))

    y2_ref, logdet2_ref, mean2_ref, var2_ref = _reference_forward(x2, log_gamma, beta, 1e-5)
    assert jnp.allclose(y2, y2_ref, atol=1e-4, rtol=1e-4)
    assert jnp.allclose(logdet2, logdet2_ref, atol=1e-4, rtol=1e-4)
    assert jnp.allclose(rm2, running_mean * 0.9 + mean2_ref * 0.1, atol=1e-4, rtol=1e-4)
    assert jnp.allclose(rv2, running_var * 0.9 + var2_ref * 0.1, atol=1e-4, rtol=1e-4)

    print("KERNEL_OK")
</pallas_src>

<mosaic_0001>
module attributes {stable_mosaic.version = 11 : i64} {
  func.func @_bn_train_kernel(%arg0: i32, %arg1: memref<16x128xf32, #tpu.memory_space<vmem>>, %arg2: memref<1x128xf32, #tpu.memory_space<vmem>>, %arg3: memref<1x128xf32, #tpu.memory_space<vmem>>, %arg4: memref<16x128xf32, #tpu.memory_space<vmem>>, %arg5: memref<1x128xf32, #tpu.memory_space<vmem>>, %arg6: memref<1x128xf32, #tpu.memory_space<vmem>>, %arg7: memref<1x128xf32, #tpu.memory_space<vmem>>) attributes {dimension_semantics = [#tpu.dimension_semantics<parallel>], iteration_bounds = array<i64: 1>, scalar_prefetch = 0 : i64, scratch_operands = 0 : i64, tpu.core_type = #tpu.core_type<tc>, window_params = [{transform_indices = @transform_0, window_bounds = array<i64: 16, 128>}, {transform_indices = @transform_1, window_bounds = array<i64: 1, 128>}, {transform_indices = @transform_2, window_bounds = array<i64: 1, 128>}, {transform_indices = @transform_3, window_bounds = array<i64: 16, 128>}, {transform_indices = @transform_4, window_bounds = array<i64: 1, 128>}, {transform_indices = @transform_5, window_bounds = array<i64: 1, 128>}, {transform_indices = @transform_6, window_bounds = array<i64: 1, 128>}]} {
    %c0 = arith.constant 0 : index
    %c0_0 = arith.constant 0 : index
    %0 = vector.load %arg1[%c0, %c0_0] : memref<16x128xf32, #tpu.memory_space<vmem>>, vector<16x128xf32>
    %cst = arith.constant dense<0.000000e+00> : vector<128xf32>
    %1 = vector.multi_reduction <add>, %0, %cst [0] : vector<16x128xf32> to vector<128xf32>
    %2 = vector.shape_cast %1 : vector<128xf32> to vector<1x128xf32>
    %cst_1 = arith.constant 6.250000e-02 : f32
    %3 = vector.broadcast %cst_1 : f32 to vector<1x128xf32>
    %4 = arith.mulf %2, %3 : vector<1x128xf32>
    %5 = vector.broadcast %4 : vector<1x128xf32> to vector<16x128xf32>
    %6 = arith.subf %0, %5 : vector<16x128xf32>
    %7 = arith.mulf %6, %6 : vector<16x128xf32>
    %cst_2 = arith.constant dense<0.000000e+00> : vector<128xf32>
    %8 = vector.multi_reduction <add>, %7, %cst_2 [0] : vector<16x128xf32> to vector<128xf32>
    %9 = vector.shape_cast %8 : vector<128xf32> to vector<1x128xf32>
    %cst_3 = arith.constant 6.250000e-02 : f32
    %10 = vector.broadcast %cst_3 : f32 to vector<1x128xf32>
    %11 = arith.mulf %9, %10 : vector<1x128xf32>
    %cst_4 = arith.constant 9.99999974E-6 : f32
    %12 = vector.broadcast %cst_4 : f32 to vector<1x128xf32>
    %13 = arith.addf %11, %12 : vector<1x128xf32>
    %14 = math.rsqrt %13 : vector<1x128xf32>
    %c0_5 = arith.constant 0 : index
    %c0_6 = arith.constant 0 : index
    %15 = vector.load %arg2[%c0_5, %c0_6] : memref<1x128xf32, #tpu.memory_space<vmem>>, vector<1x128xf32>
    %16 = math.exp %15 : vector<1x128xf32>
    %17 = arith.mulf %16, %14 : vector<1x128xf32>
    %18 = vector.broadcast %17 : vector<1x128xf32> to vector<16x128xf32>
    %19 = arith.mulf %6, %18 : vector<16x128xf32>
    %c0_7 = arith.constant 0 : index
    %c0_8 = arith.constant 0 : index
    %20 = vector.load %arg3[%c0_7, %c0_8] : memref<1x128xf32, #tpu.memory_space<vmem>>, vector<1x128xf32>
    %21 = vector.broadcast %20 : vector<1x128xf32> to vector<16x128xf32>
    %22 = arith.addf %19, %21 : vector<16x128xf32>
    %c0_9 = arith.constant 0 : index
    %c0_10 = arith.constant 0 : index
    %23 = vector.load %arg4[%c0_9, %c0_10] : memref<16x128xf32, #tpu.memory_space<vmem>>, vector<16x128xf32>
    tpu.vector_store %arg4[%c0_9, %c0_10], %22 {strides = array<i32>} : memref<16x128xf32, #tpu.memory_space<vmem>>, vector<16x128xf32>,
    %c0_11 = arith.constant 0 : index
    %c0_12 = arith.constant 0 : index
    %24 = vector.load %arg5[%c0_11, %c0_12] : memref<1x128xf32, #tpu.memory_space<vmem>>, vector<1x128xf32>
    tpu.vector_store %arg5[%c0_11, %c0_12], %4 {strides = array<i32>} : memref<1x128xf32, #tpu.memory_space<vmem>>, vector<1x128xf32>,
    %c0_13 = arith.constant 0 : index
    %c0_14 = arith.constant 0 : index
    %25 = vector.load %arg6[%c0_13, %c0_14] : memref<1x128xf32, #tpu.memory_space<vmem>>, vector<1x128xf32>
    tpu.vector_store %arg6[%c0_13, %c0_14], %11 {strides = array<i32>} : memref<1x128xf32, #tpu.memory_space<vmem>>, vector<1x128xf32>,
    %cst_15 = arith.constant 9.99999974E-6 : f32
    %26 = vector.broadcast %cst_15 : f32 to vector<1x128xf32>
    %27 = arith.addf %11, %26 : vector<1x128xf32>
    %28 = math.log %27 : vector<1x128xf32>
    %cst_16 = arith.constant 5.000000e-01 : f32
    %29 = vector.broadcast %cst_16 : f32 to vector<1x128xf32>
    %30 = arith.mulf %29, %28 : vector<1x128xf32>
    %31 = arith.subf %15, %30 : vector<1x128xf32>
    %c0_17 = arith.constant 0 : index
    %c0_18 = arith.constant 0 : index
    %32 = vector.load %arg7[%c0_17, %c0_18] : memref<1x128xf32, #tpu.memory_space<vmem>>, vector<1x128xf32>
    tpu.vector_store %arg7[%c0_17, %c0_18], %31 {strides = array<i32>} : memref<1x128xf32, #tpu.memory_space<vmem>>, vector<1x128xf32>,
    return
  }
  func.func @transform_0(%arg0: i32) -> (i32, i32) {
    %c0_i32 = arith.constant 0 : i32
    %c0_i32_0 = arith.constant 0 : i32
    return %c0_i32, %arg0 : i32, i32
  }
  func.func @transform_1(%arg0: i32) -> (i32, i32) {
    %c0_i32 = arith.constant 0 : i32
    %c0_i32_0 = arith.constant 0 : i32
    return %c0_i32, %arg0 : i32, i32
  }
  func.func @transform_2(%arg0: i32) -> (i32, i32) {
    %c0_i32 = arith.constant 0 : i32
    %c0_i32_0 = arith.constant 0 : i32
    return %c0_i32, %arg0 : i32, i32
  }
  func.func @transform_3(%arg0: i32) -> (i32, i32) {
    %c0_i32 = arith.constant 0 : i32
    %c0_i32_0 = arith.constant 0 : i32
    return %c0_i32, %arg0 : i32, i32
  }
  func.func @transform_4(%arg0: i32) -> (i32, i32) {
    %c0_i32 = arith.constant 0 : i32
    %c0_i32_0 = arith.constant 0 : i32
    return %c0_i32, %arg0 : i32, i32
  }
  func.func @transform_5(%arg0: i32) -> (i32, i32) {
    %c0_i32 = arith.constant 0 : i32
    %c0_i32_0 = arith.constant 0 : i32
    return %c0_i32, %arg0 : i32, i32
  }
  func.func @transform_6(%arg0: i32) -> (i32, i32) {
    %c0_i32 = arith.constant 0 : i32
    %c0_i32_0 = arith.constant 0 : i32
    return %c0_i32, %arg0 : i32, i32
  }
}

</mosaic_0001>

<bundles_post_ra>
// kernel: tpu_custom_call.1
= control target key start
LH: loop header
LB: loop body
LE: loop exit
PB: predicated region body
PF: predicated region fallthrough
CT: control target
= control target key end

     0   :  { %12 = vsyncpa [#allocation3], 0  ;;  %s338_s0 = inlined_call_operand.hbm [shape: f32[16,128], index: 0, kind: input, shape index: {}]   ;;  %s339_s1 = inlined_call_operand.vmem [shape: f32[1,128], index: 1, kind: input, shape index: {}]   ;;  %s340_s2 = inlined_call_operand.vmem [shape: f32[1,128], index: 2, kind: input, shape index: {}]   ;;  %s341_s3 = inlined_call_operand.hbm [shape: f32[16,128], index: 3, kind: output, shape index: {0}]   ;;  %s342_s4 = inlined_call_operand.hbm [shape: f32[1,128], index: 4, kind: output, shape index: {1}]   ;;  %s343_s5 = inlined_call_operand.hbm [shape: f32[1,128], index: 5, kind: output, shape index: {2}]   ;;  %s344_s6 = inlined_call_operand.hbm [shape: f32[1,128], index: 6, kind: output, shape index: {3}]  }
   0x1   :  { %13 = vsyncpa [#allocation4], 0 }
   0x2   :  { %14 = vsyncpa [#allocation7], 0 }
   0x3   :  { %15 = vsyncpa [#allocation10], 0  ;;  %s269_s21 = smov [#allocation2]  }
   0x4   :  { %s21_s22 = sshll.u32 %s269_s21, 4  ;;  %s22_s22 = int_to_ptr.vmem [resolvable:$true] %s21_s22 }
   0x5   :  { %s169_s23 = scalar_lea.vmem %s22_s22, 256  ;;  %p174_p1 = scmp.lt.s32.totalorder %s22_s22, %s22_s22 }
   0x6   :  { %p170_p0 = scmp.ne.s32.totalorder %s22_s22, %s169_s23  ;;  %p175_p2 = scmp.lt.s32.totalorder %s169_s23, %s169_s23 }
   0x8   :  { %p176_p3 = por %p175_p2, %p174_p1 }
   0xa   :  { %p177_p4 = pnand %p176_p3, %p170_p0 }
   0xc   :  { %180 = shalt.err (!%p177_p4)
}
   0xd   :  { %s270_s24 = smov 128   ;;  %s271_s25 = smov 8  }
   0xe   :  { %27 = dma.hbm_to_vmem [thread:$0]  %s338_s0, 256, %s22_s22, [#allocation3], %s270_s24, %s270_s24, %s271_s25  }
   0xf   :  { %261 = dma.done.wait [#allocation3], 256  }
  0x10   :  { %262 = vsyncadd [#allocation3], 4294967040  ;;  %v35_v0 = vld [vmem:[#allocation2] sm:$0xff]  ;;  %v36_v1 = vld [vmem:[#allocation2 + $0x8] sm:$0xff]  ;;  %s272_s28 = smov [#allocation6]  }
  0x11   :  { %v37_v2 = vadd.f32 %v36_v1, %v35_v0  ;;  %s107_s29 = sshll.u32 %s272_s28, 4  ;;  %s108_s29 = int_to_ptr.vmem [resolvable:$true] %s107_s29 }
  0x12   :  { %s181_s30 = scalar_lea.vmem %s108_s29, 16  ;;  %s185_s0 = scalar_lea.vmem %s108_s29, 32 }
  0x13   :  { %v38_v3 = vrot.slane %v37_v2, 4  ;;  %p182_p5 = scmp.ne.s32.totalorder %s108_s29, %s181_s30  ;;  %p186_p6 = scmp.lt.s32.totalorder %s108_s29, %s108_s29 }
  0x14   :  { %p187_p7 = scmp.lt.s32.totalorder %s185_s0, %s181_s30 }
  0x15   :  { %v39_v4 = vadd.f32 %v38_v3, %v37_v2 }
  0x16   :  { %p188_p8 = por %p187_p7, %p186_p6 }
  0x17   :  { %v40_v5 = vrot.slane %v39_v4, 2 }
  0x18   :  { %p189_p9 = pnand %p188_p8, %p182_p5 }
  0x19   :  { %v41_v6 = vadd.f32 %v40_v5, %v39_v4 }
  0x1b   :  { %v42_v7 = vrot.slane %v41_v6, 1 }
  0x1d   :  { %v43_v8 = vadd.f32 %v42_v7, %v41_v6 }
  0x1f   :  { %v44_v9 = vmul.f32 0.0625, %v43_v8 }
  0x21   :  { %v46_v10 = vsub.f32 %v36_v1, %v44_v9  ;;  %82 = vst [vmem:[#allocation6] sm:$0x1] %v44_v9  ;;  %v45_v11 = vsub.f32 %v35_v0, %v44_v9 }
  0x22   :  { %192 = shalt.err (!%p189_p9)
}
  0x23   :  { %110 = dma.vmem_to_hbm [thread:$0]  %s108_s29, 16, %s342_s4, [#allocation7]   ;;  %v48_v12 = vmul.f32 %v46_v10, %v46_v10  ;;  %v47_v13 = vmul.f32 %v45_v11, %v45_v11  ;;  %v59_v19 = vld [vmem:[%s339_s1] sm:$0x1] }
  0x24   :  { %s273_s11 = smov [#allocation8]   ;;  %v60_v22 = vmul.f32 1.442695, %v59_v19 }
  0x25   :  { %v49_v14 = vadd.f32 %v48_v12, %v47_v13  ;;  %s117_s12 = sshll.u32 %s273_s11, 4  ;;  %s118_s12 = int_to_ptr.vmem [resolvable:$true] %s117_s12 }
  0x26   :  { %155 = vpow2.f32 %v60_v22  ;;  %s201_s4 = scalar_lea.vmem %s118_s12, 16  ;;  %s205_s13 = scalar_lea.vmem %s118_s12, 32 }
  0x27   :  { %v50_v15 = vrot.slane %v49_v14, 4  ;;  %p202_p10 = scmp.ne.s32.totalorder %s118_s12, %s201_s4  ;;  %p206_p11 = scmp.lt.s32.totalorder %s118_s12, %s118_s12 }
  0x28   :  { %p207_p12 = scmp.lt.s32.totalorder %s205_s13, %s201_s4 }
  0x29   :  { %v51_v16 = vadd.f32 %v50_v15, %v49_v14 }
  0x2a   :  { %p208_p13 = por %p207_p12, %p206_p11 }
  0x2b   :  { %v52_v17 = vrot.slane %v51_v16, 2 }
  0x2c   :  { %p209_p0 = pnand %p208_p13, %p202_p10 }
  0x2d   :  { %v53_v18 = vadd.f32 %v52_v17, %v51_v16 }
  0x2f   :  { %v54_v20 = vrot.slane %v53_v18, 1 }
  0x31   :  { %v55_v21 = vadd.f32 %v54_v20, %v53_v18 }
  0x33   :  { %v56_v23 = vmul.f32 0.0625, %v55_v21 }
  0x35   :  { %v57_v24 = vadd.f32 1e-05, %v56_v23  ;;  %83 = vst [vmem:[#allocation8] sm:$0x1] %v56_v23 }
  0x36   :  { %212 = shalt.err (!%p209_p0)
}
  0x37   :  { %120 = dma.vmem_to_hbm [thread:$0]  %s118_s12, 16, %s343_s5, [#allocation7]   ;;  %157 = vrsqrt.f32 %v57_v24  ;;  %v64_v25 = vlaneseq  ;;  %v156_v27 = vpop.eup %155  ;;  %v147_v34 = vld [vmem:[%s340_s2] ss:$0 sm:$0xff] }
  0x38   :  { %159 = vlog2.f32 %v57_v24  ;;  %s274_s15 = smov [#allocation9]   ;;  %s275_s19 = smov [#allocation5]  }
  0x39   :  { %v65_v26 = vshrl.u32 %v64_v25, 7  ;;  %s127_s16 = sshll.u32 %s274_s15, 4  ;;  %s94_s5 = sshll.u32 %s275_s19, 4  ;;  %s128_s16 = int_to_ptr.vmem [resolvable:$true] %s127_s16  ;;  %s95_s5 = int_to_ptr.vmem [resolvable:$true] %s94_s5 }
  0x3a   :  { %s221_s20 = scalar_lea.vmem %s128_s16, 16  ;;  %s225_s21 = scalar_lea.vmem %s128_s16, 32 }
  0x3b   :  { %v66_v28 = vsub.s32 0, %v65_v26  ;;  %p222_p1 = scmp.ne.s32.totalorder %s128_s16, %s221_s20  ;;  %p226_p2 = scmp.lt.s32.totalorder %s128_s16, %s128_s16 }
  0x3c   :  { %p227_p3 = scmp.lt.s32.totalorder %s225_s21, %s221_s20 }
  0x3e   :  { %p228_p4 = por %p227_p3, %p226_p2 }
  0x40   :  { %p229_p5 = pnand %p228_p4, %p222_p1 }
  0x44   :  { %v158_v29 = vpop.eup %157 }
  0x45   :  { %v160_v30 = vpop.eup %159  ;;  %v62_v31 = vmul.f32 %v158_v29, %v156_v27 }
  0x46   :  { %v85_v32 = vmul.f32 0.6931472, %v160_v30 }
  0x47   :  { %v67_v33 = vrot.slane %v62_v31, %v66_v28 }
  0x48   :  { %v86_v35 = vmul.f32 0.5, %v85_v32 }
  0x49   :  { %v69_v36 = vmul.f32 %v67_v33, %v45_v11  ;;  %v70_v37 = vmul.f32 %v67_v33, %v46_v10 }
  0x4a   :  { %v87_v38 = vsub.f32 %v59_v19, %v86_v35 }
  0x4b   :  { %v78_v39 = vadd.f32 %v147_v34, %v69_v36  ;;  %v79_v40 = vadd.f32 %v147_v34, %v70_v37 }
  0x4c   :  { %88 = vst [vmem:[#allocation9] sm:$0x1] %v87_v38 }
  0x4d   :  { %80 = vst [vmem:[#allocation5] sm:$0xff] %v78_v39  ;;  %81 = vst [vmem:[#allocation5 + $0x8] sm:$0xff] %v79_v40 }
  0x4e   :  { %232 = shalt.err (!%p229_p5)
}
  0x4f   :  { %130 = dma.vmem_to_hbm [thread:$0]  %s128_s16, 16, %s344_s6, [#allocation10]  }
  0x50   :  { %s241_s23 = scalar_lea.vmem %s95_s5, 256  ;;  %p246_p7 = scmp.lt.s32.totalorder %s95_s5, %s95_s5 }
  0x51   :  { %p242_p6 = scmp.ne.s32.totalorder %s95_s5, %s241_s23  ;;  %p247_p8 = scmp.lt.s32.totalorder %s241_s23, %s241_s23 }
  0x53   :  { %p248_p9 = por %p247_p8, %p246_p7 }
  0x55   :  { %p249_p10 = pnand %p248_p9, %p242_p6 }
  0x57   :  { %252 = shalt.err (!%p249_p10)
}
  0x58   :  { %100 = dma.vmem_to_hbm [thread:$0]  %s95_s5, 256, %s341_s3, [#allocation4], %s270_s24, %s270_s24, %s271_s25  }
  0x59   :  { %263 = dma.done.wait [#allocation4], 256  }
  0x5a   :  { %264 = vsyncadd [#allocation4], 4294967040 }
  0x5b   :  { %265 = dma.done.wait [#allocation7], 32  }
  0x5c   :  { %266 = vsyncadd [#allocation7], 4294967264 }
  0x5d   :  { %267 = dma.done.wait [#allocation10], 16  }
  0x5e   :  { %268 = vsyncadd [#allocation10], 4294967280 }
  0x5f   :  { %143 = vsyncpa [#allocation3], 1 }
  0x60   :  { %144 = vsyncpa [#allocation4], 1 }
  0x61   :  { %145 = vsyncpa [#allocation7], 1 }
  0x62   :  { %146 = vsyncpa [#allocation10], 1 }

</bundles_post_ra>
